<compile_context>
chip_gen: v7x
topology: tpu7x:2x2x1
jax: 0.10.0
libtpu: 0.0.40
codegen_flags: <defaults>
</compile_context>

<pallas_src>
import functools

import jax
import jax.numpy as jnp
from jax import lax
from jax.experimental import pallas as pl
from jax.experimental.pallas import tpu as pltpu


def _cdiv(a, b):
    return -(-a // b)


def _round_up(v, m):
    return _cdiv(v, m) * m


def _sublane(dtype):
    # Required second-minor alignment per dtype (f32: 8, bf16: 16, int8/fp8: 32).
    return max(8, 32 // jnp.dtype(dtype).itemsize)


def _plan_dim(size, align, max_tile):
    """Split `size` into near-equal, `align`-multiple tiles no larger than
    `max_tile`.  Returns (tile, padded_size, grid)."""
    size_a = _round_up(size, align)
    cap = _round_up(max(align, min(max_tile, size_a)), align)
    grid = _cdiv(size_a, cap)
    tile = _round_up(_cdiv(size_a, grid), align)
    return tile, tile * grid, grid


def _linear_kernel_acc(x_ref, w_ref, o_ref, acc_ref):
    """(tm, tk) x (tn, tk) -> (tm, tn), f32 scratch accumulator; downcast and
    store at the last K step (used when the output dtype is narrower than f32)."""
    @pl.when(pl.program_id(2) == 0)
    def _():
        acc_ref[...] = jnp.zeros_like(acc_ref)

    acc_ref[...] += lax.dot_general(
        x_ref[...],
        w_ref[...],
        dimension_numbers=(((1,), (1,)), ((), ())),  # contract dim_in of both -> x @ W.T
        preferred_element_type=jnp.float32,
    )

    @pl.when(pl.program_id(2) == pl.num_programs(2) - 1)
    def _():
        o_ref[...] = acc_ref[...].astype(o_ref.dtype)


def _linear_kernel_f32_out(x_ref, w_ref, o_ref):
    """f32 output: accumulate straight into o_ref (VMEM-resident across the K
    axis because its index_map ignores k) -> no scratch, no final tile copy."""
    @pl.when(pl.program_id(2) == 0)
    def _():
        o_ref[...] = jnp.zeros_like(o_ref)

    o_ref[...] += lax.dot_general(
        x_ref[...],
        w_ref[...],
        dimension_numbers=(((1,), (1,)), ((), ())),
        preferred_element_type=jnp.float32,
    )


@functools.partial(
    jax.jit, static_argnames=("tm", "tn", "tk", "compute_dtype", "allow_fast_path")
)
def linear_no_bias(x, weight, *, tm=512, tn=512, tk=1024,
                   compute_dtype=None, allow_fast_path=True):
    """y = x @ weight.T   (weight shape: (dim_out, dim_in), PyTorch convention)."""
    dim_out, dim_in = weight.shape
    orig_shape = x.shape
    assert orig_shape[-1] == dim_in

    out_dtype = jnp.result_type(x.dtype, weight.dtype)
    in_dtype = jnp.dtype(compute_dtype) if compute_dtype is not None else out_dtype
    in_bytes = jnp.dtype(in_dtype).itemsize
    out_bytes = jnp.dtype(out_dtype).itemsize
    needs_acc = out_dtype != jnp.float32

    x2d = x.reshape(-1, dim_in)
    m = x2d.shape[0]

    # --- per-generation VMEM budget (v5e/v6e: 128 MiB, v7x: 64 MiB) ----------
    try:
        vmem_cap = int(pltpu.get_tpu_info().vmem_capacity_bytes)
    except Exception:  # conservative fallback = smallest generation (v7x)
        vmem_cap = 64 << 20
    budget = int(0.40 * vmem_cap)

    # Small-M problems: keep the whole M in one tile so the weight matrix
    # streams from HBM exactly once (grid_m == 1).
    m_align = max(_sublane(in_dtype), _sublane(out_dtype))
    m_a = _round_up(m, m_align)
    tm_cap = m_a if m_a <= max(tm, 1024) else tm
    tn_cap, tk_cap = tn, tk

    def _resident_bytes(tm_, tn_, tk_):
        b = 2 * (tm_ * tk_ + tn_ * tk_) * in_bytes   # double-buffered inputs
        b += 2 * tm_ * tn_ * out_bytes               # double-buffered output
        if needs_acc:
            b += tm_ * tn_ * 4                       # f32 accumulator scratch
        return b

    while True:
        tm_t, m_p, gm = _plan_dim(m, m_align, tm_cap)
        tn_t, n_p, gn = _plan_dim(dim_out, 128, tn_cap)
        tk_t, k_p, gk = _plan_dim(dim_in, 128, tk_cap)
        if _resident_bytes(tm_t, tn_t, tk_t) <= budget:
            break
        if tk_cap > 128:                 # shrink K first: only inputs grow with K
            tk_cap = _round_up(max(128, tk_cap // 2), 128)
        elif tn_cap > 128:
            tn_cap = _round_up(max(128, tn_cap // 2), 128)
        elif tm_cap > m_align:
            tm_cap = _round_up(max(m_align, tm_cap // 2), m_align)
        else:
            break

    # --- tiny problems: pad + pallas_call overhead dominates; use fused dot --
    if allow_fast_path and gm * gn * gk == 1:
        y2d = jnp.dot(
            x2d.astype(in_dtype), weight.astype(in_dtype).T,
            preferred_element_type=jnp.float32,
        ).astype(out_dtype)
        return y2d.reshape(*orig_shape[:-1], dim_out)

    # --- zero-pad to tile multiples (zeros contribute nothing to the dot) ----
    x2d = x2d.astype(in_dtype)
    w = weight.astype(in_dtype)
    if (m_p, k_p) != (m, dim_in):
        x2d = jnp.pad(x2d, ((0, m_p - m), (0, k_p - dim_in)))
    if (n_p, k_p) != (dim_out, dim_in):
        w = jnp.pad(w, ((0, n_p - dim_out), (0, k_p - dim_in)))

    grid = (gm, gn, gk)

    if needs_acc:
        kernel = _linear_kernel_acc
        scratch_shapes = [pltpu.VMEM((tm_t, tn_t), jnp.float32)]
    else:
        kernel = _linear_kernel_f32_out
        scratch_shapes = []

    # Real traffic: x is re-streamed once per N tile, W once per M tile.
    cost = pl.CostEstimate(
        flops=2 * m_p * k_p * n_p,
        transcendentals=0,
        bytes_accessed=(gn * m_p * k_p + gm * n_p * k_p) * in_bytes
        + m_p * n_p * out_bytes,
    )

    vmem_limit = int(
        min(0.70 * vmem_cap,
            max(32 << 20, _resident_bytes(tm_t, tn_t, tk_t) + (16 << 20)))
    )

    out2d = pl.pallas_call(
        kernel,
        out_shape=jax.ShapeDtypeStruct((m_p, n_p), out_dtype),
        grid_spec=pltpu.PrefetchScalarGridSpec(
            num_scalar_prefetch=0,
            grid=grid,
            in_specs=[
                pl.BlockSpec((tm_t, tk_t), lambda i, j, k: (i, k)),
                # Weight kept in (dim_out, dim_in) layout; contraction is on
                # the last axis of both operands (no wrapper-side weight.T).
                pl.BlockSpec((tn_t, tk_t), lambda i, j, k: (j, k)),
            ],
            out_specs=pl.BlockSpec((tm_t, tn_t), lambda i, j, k: (i, j)),
            scratch_shapes=scratch_shapes,
        ),
        compiler_params=pltpu.CompilerParams(
            dimension_semantics=("parallel", "parallel", "arbitrary"),
            vmem_limit_bytes=vmem_limit,
        ),
        cost_estimate=cost,
    )(x2d, w)

    if (m_p, n_p) != (m, dim_out):
        out2d = out2d[:m, :dim_out]
    return out2d.reshape(*orig_shape[:-1], dim_out)


if __name__ == "__main__":
    # LinearNoBias module: dim_in=32, dim_out=64; input (batch=2, seq=8, dim_in).
    batch, seq, dim_in, dim_out = 2, 8, 32, 64

    key = jax.random.PRNGKey(0)
    kx, kw = jax.random.split(key)
    x = jax.random.normal(kx, (batch, seq, dim_in), dtype=jnp.float32)

    # Deterministic init mimicking nn.Linear's default:
    # U(-1/sqrt(dim_in), 1/sqrt(dim_in)), weight shape (dim_out, dim_in).
    bound = 1.0 / (dim_in ** 0.5)
    weight = jax.random.uniform(
        kw, (dim_out, dim_in), dtype=jnp.float32, minval=-bound, maxval=bound
    )

    # 1) Small module-sized shape, forced through the Pallas kernel.
    y = linear_no_bias(x, weight, allow_fast_path=False)
    jax.block_until_ready(y)
    assert y.shape == (batch, seq, dim_out)
    assert jnp.allclose(y, x @ weight.T, atol=1e-5, rtol=1e-5)

    # 2) Multi-tile path: grid > 1 on every axis, non-power-of-two tiles,
    #    f32 accumulate-into-output kernel.
    m2, k2, n2 = 1536, 2304, 896
    k1, k2_ = jax.random.split(jax.random.PRNGKey(1))
    x_big = jax.random.normal(k1, (m2, k2), dtype=jnp.float32)
    w_big = jax.random.normal(k2_, (n2, k2), dtype=jnp.float32) * 0.02
    y_big = linear_no_bias(x_big, w_big)
    jax.block_until_ready(y_big)
    y_big_ref = jnp.dot(x_big, w_big.T, precision=lax.Precision.HIGHEST)
    assert jnp.allclose(y_big, y_big_ref, atol=5e-3, rtol=5e-3)

    # 3) Ragged shapes (minimal-padding path), forced through the Pallas kernel.
    kx3, kw3 = jax.random.split(jax.random.PRNGKey(2))
    x_r = jax.random.normal(kx3, (300, 200), dtype=jnp.float32)
    w_r = jax.random.normal(kw3, (130, 200), dtype=jnp.float32) * 0.05
    y_r = linear_no_bias(x_r, w_r, allow_fast_path=False)
    jax.block_until_ready(y_r)
    y_r_ref = jnp.dot(x_r, w_r.T, precision=lax.Precision.HIGHEST)
    assert y_r.shape == (300, 130)
    assert jnp.allclose(y_r, y_r_ref, atol=5e-3, rtol=5e-3)

    # 4) bf16 operands -> f32-scratch accumulator kernel (K reduction, gk=3).
    x_b = jax.random.normal(jax.random.PRNGKey(3), (256, 2304), jnp.float32)
    w_b = jax.random.normal(jax.random.PRNGKey(4), (384, 2304), jnp.float32) * 0.02
    y_b = linear_no_bias(x_b.astype(jnp.bfloat16), w_b.astype(jnp.bfloat16))
    jax.block_until_ready(y_b)
    y_b_ref = jnp.dot(
        x_b.astype(jnp.bfloat16).astype(jnp.float32),
        w_b.astype(jnp.bfloat16).astype(jnp.float32).T,
        precision=lax.Precision.HIGHEST,
    )
    assert jnp.allclose(y_b.astype(jnp.float32), y_b_ref, atol=2e-2, rtol=2e-2)

    print("KERNEL_OK")
</pallas_src>

<mosaic_0001>
module attributes {stable_mosaic.version = 11 : i64} {
  func.func @_linear_kernel_f32_out(%arg0: i32, %arg1: i32, %arg2: i32, %arg3: memref<16x128xf32, #tpu.memory_space<vmem>>, %arg4: memref<128x128xf32, #tpu.memory_space<vmem>>, %arg5: memref<16x128xf32, #tpu.memory_space<vmem>>) attributes {dimension_semantics = [#tpu.dimension_semantics<parallel>, #tpu.dimension_semantics<parallel>, #tpu.dimension_semantics<arbitrary>], iteration_bounds = array<i64: 1, 1, 1>, scalar_prefetch = 0 : i64, scratch_operands = 0 : i64, tpu.core_type = #tpu.core_type<tc>, window_params = [{transform_indices = @transform_0, window_bounds = array<i64: 16, 128>}, {transform_indices = @transform_1, window_bounds = array<i64: 128, 128>}, {transform_indices = @transform_2, window_bounds = array<i64: 16, 128>}]} {
    %c0_i32 = arith.constant 0 : i32
    %0 = arith.cmpi eq, %arg2, %c0_i32 : i32
    %1 = arith.extui %0 : i1 to i32
    %c0_i32_0 = arith.constant 0 : i32
    %2 = arith.cmpi ne, %1, %c0_i32_0 : i32
    scf.if %2 {
      %cst_8 = arith.constant 0.000000e+00 : f32
      %9 = vector.broadcast %cst_8 : f32 to vector<16x128xf32>
      %c0_9 = arith.constant 0 : index
      %c0_10 = arith.constant 0 : index
      %10 = vector.load %arg5[%c0_9, %c0_10] : memref<16x128xf32, #tpu.memory_space<vmem>>, vector<16x128xf32>
      tpu.vector_store %arg5[%c0_9, %c0_10], %9 {strides = array<i32>} : memref<16x128xf32, #tpu.memory_space<vmem>>, vector<16x128xf32>,
    } else {
    }
    %c0 = arith.constant 0 : index
    %c0_1 = arith.constant 0 : index
    %3 = vector.load %arg5[%c0, %c0_1] : memref<16x128xf32, #tpu.memory_space<vmem>>, vector<16x128xf32>
    %c0_2 = arith.constant 0 : index
    %c0_3 = arith.constant 0 : index
    %4 = vector.load %arg3[%c0_2, %c0_3] : memref<16x128xf32, #tpu.memory_space<vmem>>, vector<16x128xf32>
    %c0_4 = arith.constant 0 : index
    %c0_5 = arith.constant 0 : index
    %5 = vector.load %arg4[%c0_4, %c0_5] : memref<128x128xf32, #tpu.memory_space<vmem>>, vector<128x128xf32>
    %cst = arith.constant dense<0.000000e+00> : vector<16x128xf32>
    %6 = tpu.matmul %4, %5, %cst {dimension_numbers = #tpu.dot_dimension_numbers<[1], [1], [0], [0], [0, 0, 1, 0], [], []>} : vector<16x128xf32>, vector<128x128xf32>, vector<16x128xf32> -> vector<16x128xf32>
    %7 = arith.addf %3, %6 : vector<16x128xf32>
    %c0_6 = arith.constant 0 : index
    %c0_7 = arith.constant 0 : index
    %8 = vector.load %arg5[%c0_6, %c0_7] : memref<16x128xf32, #tpu.memory_space<vmem>>, vector<16x128xf32>
    tpu.vector_store %arg5[%c0_6, %c0_7], %7 {strides = array<i32>} : memref<16x128xf32, #tpu.memory_space<vmem>>, vector<16x128xf32>,
    return
  }
  func.func @transform_0(%arg0: i32, %arg1: i32, %arg2: i32) -> (i32, i32) {
    %c0_i32 = arith.constant 0 : i32
    return %arg0, %arg2 : i32, i32
  }
  func.func @transform_1(%arg0: i32, %arg1: i32, %arg2: i32) -> (i32, i32) {
    %c0_i32 = arith.constant 0 : i32
    return %arg1, %arg2 : i32, i32
  }
  func.func @transform_2(%arg0: i32, %arg1: i32, %arg2: i32) -> (i32, i32) {
    %c0_i32 = arith.constant 0 : i32
    return %arg0, %arg1 : i32, i32
  }
}

</mosaic_0001>

<bundles_post_ra>
// kernel: linear_no_bias.1
= control target key start
LH: loop header
LB: loop body
LE: loop exit
PB: predicated region body
PF: predicated region fallthrough
CT: control target
= control target key end

     0   :  { %s281_s1 = inlined_call_operand.vmem [shape: f32[128,128], index: 1, kind: input, shape index: {}]   ;;  %s282_s0 = inlined_call_operand.vmem [shape: f32[16,128], index: 0, kind: input, shape index: {}]   ;;  %s283_s2 = inlined_call_operand.vmem [shape: f32[16,128], index: 2, kind: output, shape index: {}]  }
   0x1   :  { %v21_v0 = vld [vmem:[%s281_s1] sm:$0xff]  ;;  %v22_v1 = vld [vmem:[%s281_s1 + $0x8] sm:$0xff]  ;;  %v23_v2 = vld [vmem:[%s281_s1 + $0x10] sm:$0xff] }
   0x2   :  { %v173_v3 = vpack.c.bf16 %v22_v1, %v21_v0  ;;  %v24_v4 = vld [vmem:[%s281_s1 + $0x18] sm:$0xff]  ;;  %v19_v6 = vld [vmem:[%s282_s0] sm:$0xff]  ;;  %v26_v8 = vld [vmem:[%s281_s1 + $0x28] sm:$0xff] }
   0x3   :  { %v177_v5 = vpack.c.bf16 %v24_v4, %v23_v2  ;;  %v25_v7 = vld [vmem:[%s281_s1 + $0x20] sm:$0xff]  ;;  %170 = vmatprep.mubr.f32.mxu0 %v19_v6  ;;  %v27_v10 = vld [vmem:[%s281_s1 + $0x30] sm:$0xff]  ;;  %v28_v11 = vld [vmem:[%s281_s1 + $0x38] sm:$0xff] }
   0x4   :  { %174 = vmatprep.subr.bf16.mxu0 %v173_v3  ;;  %v181_v9 = vpack.c.bf16 %v26_v8, %v25_v7  ;;  %v185_v12 = vpack.c.bf16 %v28_v11, %v27_v10  ;;  %v29_v13 = vld [vmem:[%s281_s1 + $0x40] sm:$0xff]  ;;  %v30_v14 = vld [vmem:[%s281_s1 + $0x48] sm:$0xff]  ;;  %v31_v16 = vld [vmem:[%s281_s1 + $0x50] sm:$0xff] }
   0x5   :  { %176 = vmatpush3.bf16.xpose.msra.mxu0 %v173_v3  ;;  %v189_v15 = vpack.c.bf16 %v30_v14, %v29_v13  ;;  %v32_v17 = vld [vmem:[%s281_s1 + $0x58] sm:$0xff]  ;;  %v33_v19 = vld [vmem:[%s281_s1 + $0x60] sm:$0xff]  ;;  %v34_v20 = vld [vmem:[%s281_s1 + $0x68] sm:$0xff] }
   0x6   :  { %178 = vmatprep.subr.bf16.mxu0 %v177_v5  ;;  %v193_v18 = vpack.c.bf16 %v32_v17, %v31_v16  ;;  %v197_v21 = vpack.c.bf16 %v34_v20, %v33_v19  ;;  %v35_v22 = vld [vmem:[%s281_s1 + $0x70] sm:$0xff]  ;;  %v36_v23 = vld [vmem:[%s281_s1 + $0x78] sm:$0xff]  ;;  %v20_v25 = vld [vmem:[%s282_s0 + $0x8] sm:$0xff] }
   0x7   :  { %v201_v24 = vpack.c.bf16 %v36_v23, %v35_v22 }
   0xd   :  { %180 = vmatpush3.bf16.xpose.msra.mxu0 %v177_v5 }
   0xe   :  { %182 = vmatprep.subr.bf16.mxu0 %v181_v9 }
  0x15   :  { %184 = vmatpush3.bf16.xpose.msra.mxu0 %v181_v9 }
  0x16   :  { %186 = vmatprep.subr.bf16.mxu0 %v185_v12 }
  0x1d   :  { %188 = vmatpush3.bf16.xpose.msra.mxu0 %v185_v12 }
  0x1e   :  { %190 = vmatprep.subr.bf16.mxu0 %v189_v15 }
  0x25   :  { %192 = vmatpush3.bf16.xpose.msra.mxu0 %v189_v15 }
  0x26   :  { %194 = vmatprep.subr.bf16.mxu0 %v193_v18 }
  0x2d   :  { %196 = vmatpush3.bf16.xpose.msra.mxu0 %v193_v18 }
  0x2e   :  { %198 = vmatprep.subr.bf16.mxu0 %v197_v21 }
  0x35   :  { %200 = vmatpush3.bf16.xpose.msra.mxu0 %v197_v21 }
  0x36   :  { %202 = vmatprep.subr.bf16.mxu0 %v201_v24 }
  0x3d   :  { %204 = vmatpush3.bf16.xpose.msra.mxu0 %v201_v24 }
  0x44   :  { %171 = vmatmul.mubr.f32.vlgmr.msra.gmra.mrb[0].mxu0 %v20_v25 }
 0x117   :  { %v172_v26 = vpop.f32.mrb[0].mxu0 }
 0x118   :  { %v103_v27 = vpop.f32.mrb[1].mxu0  ;;  %115 = vst [vmem:[%s283_s2 + $0x8] sm:$0xff] %v172_v26 }
 0x119   :  { %114 = vst [vmem:[%s283_s2] sm:$0xff] %v103_v27 }

</bundles_post_ra>
